<compile_context>
chip_gen: v6e
topology: v6e:2x2x1
jax: 0.10.0
libtpu: 0.0.40
codegen_flags: <defaults>
</compile_context>

<pallas_src>
import functools
import math

import jax
import jax.numpy as jnp
from jax import lax
from jax.experimental import pallas as pl
from jax.experimental.pallas import tpu as pltpu


# ---------------------------------------------------------------------------
# Kernel
# ---------------------------------------------------------------------------
def _pooling_head_kernel(
    x_ref,              # (TB, S, H)  bf16   key/value sequences for this batch tile
    wks_ref, bs_ref,    # (H, NHP) bf16, (1, NHP) f32  folded score weight/bias
    gt_ref,             # (nh, H) f32   head-indicator transpose (block-diag select)
    wv_ref, bv_ref,     # (H, H) bf16 (Wv^T), (1, H) f32
    wo_ref, bo_ref,     # (H, H) bf16 (Wo^T), (1, H) f32
    lnw_ref, lnb_ref,   # (1, H) f32, (1, H) f32
    w1_ref, b1_ref,     # (H, I) bf16, (1, I) f32
    w2_ref, b2_ref,     # (I, H) bf16, (1, H) f32
    out_ref,            # (TB, H) f32
    *, num_heads, eps,
):
    tb, s, h = x_ref.shape
    nhp = wks_ref.shape[1]

    x3 = x_ref[...]                                    # (TB, S, H) bf16
    x2 = x3.reshape(tb * s, h)

    # --- scores directly from x (K projection / probe query / scale folded) ---
    sc = jnp.dot(x2, wks_ref[...], preferred_element_type=jnp.float32) + bs_ref[...]
    # lane-dense softmax: put S on the lane axis, drop the padded head lanes.
    sc = jnp.transpose(sc.reshape(tb, s, nhp), (0, 2, 1))[:, :num_heads, :]  # (TB,nh,S)
    m = jnp.max(sc, axis=-1, keepdims=True)
    e = jnp.exp(sc - m)
    p = e * pl.reciprocal(jnp.sum(e, axis=-1, keepdims=True), approx=True)   # (TB,nh,S)

    # --- V path: pool first, project second ----------------------------------
    xp = jnp.einsum("bhs,bse->bhe", p.astype(x3.dtype), x3,
                    preferred_element_type=jnp.float32)                      # (TB,nh,H)
    proj = jnp.dot(xp.reshape(tb * num_heads, h).astype(wv_ref.dtype), wv_ref[...],
                   preferred_element_type=jnp.float32).reshape(tb, num_heads, h)
    # ctx[b, d] = proj[b, head(d), d] + bv[d]   (sum_s p == 1, so bv passes through)
    ctx = jnp.sum(proj * gt_ref[...][None, :, :], axis=1) + bv_ref[...]      # (TB, H)

    # --- attention output projection ------------------------------------------
    attn = jnp.dot(ctx.astype(wo_ref.dtype), wo_ref[...],
                   preferred_element_type=jnp.float32) + bo_ref[...]         # (TB, H)
    residual = attn

    # --- LayerNorm over H (f32) ------------------------------------------------
    mean = jnp.mean(attn, axis=-1, keepdims=True)
    var = jnp.mean(jnp.square(attn - mean), axis=-1, keepdims=True)
    ln = (attn - mean) * lax.rsqrt(var + eps) * lnw_ref[...] + lnb_ref[...]

    # --- MLP: fc1 -> tanh-GELU -> fc2 ------------------------------------------
    h1 = jnp.dot(ln.astype(w1_ref.dtype), w1_ref[...],
                 preferred_element_type=jnp.float32) + b1_ref[...]           # (TB, I)
    h1 = jax.nn.gelu(h1, approximate=True)
    h2 = jnp.dot(h1.astype(w2_ref.dtype), w2_ref[...],
                 preferred_element_type=jnp.float32) + b2_ref[...]           # (TB, H)

    out_ref[...] = (residual + h2).astype(out_ref.dtype)


# ---------------------------------------------------------------------------
# Capability / hardware queries and tiling plan
# ---------------------------------------------------------------------------
@functools.lru_cache(maxsize=None)
def _buffered_one_supported():
    """Probe once whether this jax build accepts single-buffered (Buffered(1))
    grid-invariant operands.  The try/except wraps ONLY this probe kernel; the
    real kernel below has no fallback and fails loudly on genuine errors."""
    def k(x_ref, w_ref, o_ref):
        o_ref[...] = x_ref[...] + w_ref[...]
    try:
        out = pl.pallas_call(
            k,
            out_shape=jax.ShapeDtypeStruct((16, 128), jnp.float32),
            grid=(2,),
            in_specs=[pl.BlockSpec((8, 128), lambda i: (i, 0)),
                      pl.BlockSpec((8, 128), lambda i: (0, 0),
                                   pipeline_mode=pl.Buffered(1))],
            out_specs=pl.BlockSpec((8, 128), lambda i: (i, 0)),
        )(jnp.zeros((16, 128), jnp.float32), jnp.ones((8, 128), jnp.float32))
        jax.block_until_ready(out)
        return True
    except Exception:
        return False


def _vmem_capacity_bytes():
    try:
        return int(pltpu.get_tpu_info().vmem_capacity_bytes)
    except Exception:
        return 64 * 1024 * 1024   # conservative (v7x per-TC size)


def _weight_resident_bytes(H, I, num_heads, NHP):
    # bf16 matrices: wks (H,NHP), Wv^T, Wo^T (H,H each), fc1^T (H,I), fc2^T (I,H)
    # f32 vectors:   bs, bv, bo, ln_w, ln_b, b1, b2, gt
    return (2 * (H * NHP + 2 * H * H + 2 * H * I)
            + 4 * (NHP + 6 * H + I + num_heads * H))


def _pick_block_b(B, cap_b):
    """Largest legal batch tile <= cap_b; prefer one that divides B (no padding)."""
    cap_b = max(1, cap_b)
    if cap_b >= B:
        return B, False                       # single tile == full batch (always legal)
    bb_max = max(8, (cap_b // 8) * 8)         # tiled output blocks: multiple of 8 rows
    for bb in range(bb_max, max(8, bb_max // 2) - 1, -8):
        if B % bb == 0:
            return bb, False                  # divides B: no padded batch rows / HBM copy
    return bb_max, True                       # awkward B: pad the tail tile


def _plan(B, S, H, I, num_heads, NHP, single_buffer_weights):
    """Fix the per-generation VMEM cap, solve for block_b, then derive the limit."""
    cap = _vmem_capacity_bytes()
    usable = int(cap * 0.85)

    weight_bytes = _weight_resident_bytes(H, I, num_heads, NHP)
    weight_bytes *= 1 if single_buffer_weights else 2     # double-buffered fallback

    # per-batch-element working set: pipelined x/out buffers + f32 intermediates
    per_b = (2 * (2 * S * H)                      # x tile (bf16) x 2 buffers
             + 2 * (4 * H)                        # out tile (f32) x 2 buffers
             + 4 * (S * NHP                       # scores
                    + 2 * num_heads * S           # softmax / p
                    + 2 * num_heads * H           # xp, proj
                    + 6 * H + I))                 # ctx/attn/ln/h1/h2
    per_b = int(per_b * 1.5)                      # headroom for compiler temporaries

    cap_b = max(1, (usable - weight_bytes) // per_b)
    if cap_b >= 512:
        cap_b = (cap_b // 256) * 256              # v6e/v7x MXU: prefer M multiple of 256
    if B >= 16:
        cap_b = min(cap_b, -(-B // 2))            # >=2 grid steps so v7x megacore can split

    block_b, needs_pad = _pick_block_b(B, cap_b)

    req = weight_bytes + block_b * per_b
    vmem_limit = int(min(cap * 0.92, max(req * 1.25, cap * 0.5)))
    return block_b, needs_pad, vmem_limit


# ---------------------------------------------------------------------------
# Wrapper
# ---------------------------------------------------------------------------
def siglip_attention_pooling_head(x, params, *, num_heads, eps):
    """x: (B, S, H).  Returns (B, H) float32 (== PyTorch module's forward[:, 0])."""
    B, S, H = x.shape
    I = params["fc1_w"].shape[0]
    assert H % num_heads == 0
    head_dim = H // num_heads
    f32, bf16 = jnp.float32, jnp.bfloat16

    # ---- batch-invariant precompute, hoisted out of the kernel --------------
    q = (params["probe"].astype(f32) @ params["wq"].astype(f32).T
         + params["bq"].astype(f32))                                        # (1, H)
    g = (jnp.arange(H, dtype=jnp.int32)[:, None] // head_dim
         == jnp.arange(num_heads, dtype=jnp.int32)[None, :]).astype(f32)    # (H, nh)
    gt = jnp.transpose(g)                                                   # (nh, H)

    # Fold q, G and 1/sqrt(d) into the key projection:
    #   scores = x @ wks + bs,  wks = Wk^T (q*G) * scale,  bs = (bk*q) G * scale
    scale = 1.0 / math.sqrt(head_dim)
    wks = (params["wk"].astype(f32).T @ (q[0][:, None] * g)) * scale        # (H, nh)
    bsc = ((params["bk"].astype(f32) * q) @ g) * scale                      # (1, nh)
    NHP = ((num_heads + 127) // 128) * 128       # pad heads to full 128-lane tiles
    wks = jnp.pad(wks, ((0, 0), (0, NHP - num_heads))).astype(bf16)
    bsc = jnp.pad(bsc, ((0, 0), (0, NHP - num_heads)))

    # pre-transposed bf16 weights (in, out layout), f32 biases
    wv_t = params["wv"].T.astype(bf16)
    wo_t = params["wo"].T.astype(bf16)
    w1_t = params["fc1_w"].T.astype(bf16)        # (H, I)
    w2_t = params["fc2_w"].T.astype(bf16)        # (I, H)
    bv = params["bv"].astype(f32)
    bo = params["bo"].astype(f32)
    lnw = params["ln_w"].astype(f32)
    lnb = params["ln_b"].astype(f32)
    b1 = params["fc1_b"].astype(f32)
    b2 = params["fc2_b"].astype(f32)

    # ---- generation-aware batch tiling / VMEM budget -------------------------
    single_buffer_weights = _buffered_one_supported()
    block_b, needs_pad, vmem_limit = _plan(B, S, H, I, num_heads, NHP,
                                           single_buffer_weights)

    xb = x.astype(bf16)
    Bp = B
    if needs_pad:
        # TODO(synk): a masked tail tile (pl.when) would avoid this extra HBM copy of x.
        Bp = ((B + block_b - 1) // block_b) * block_b
        xb = jnp.pad(xb, ((0, Bp - B), (0, 0), (0, 0)))
    n_blocks = Bp // block_b

    def const(shape):
        if single_buffer_weights:
            return pl.BlockSpec(shape, lambda b, _s=shape: (0,) * len(_s),
                                pipeline_mode=pl.Buffered(1))
        return pl.BlockSpec(shape, lambda b, _s=shape: (0,) * len(_s))

    in_specs = [
        pl.BlockSpec((block_b, S, H), lambda b: (b, 0, 0)),   # x: only pipelined input
        const((H, NHP)), const((1, NHP)),                     # wks, bs
        const((num_heads, H)),                                # G^T
        const((H, H)), const((1, H)),                         # Wv^T, bv
        const((H, H)), const((1, H)),                         # Wo^T, bo
        const((1, H)), const((1, H)),                         # ln gamma, beta
        const((H, I)), const((1, I)),                         # fc1^T, b1
        const((I, H)), const((1, H)),                         # fc2^T, b2
    ]
    out_spec = pl.BlockSpec((block_b, H), lambda b: (b, 0))

    cost = pl.CostEstimate(
        flops=2 * B * (S * H * NHP + num_heads * S * H + num_heads * H * H
                       + H * H + 2 * H * I),
        transcendentals=B * (num_heads * S + I),
        bytes_accessed=Bp * S * H * 2 + Bp * H * 4
                       + _weight_resident_bytes(H, I, num_heads, NHP),
    )

    kernel = functools.partial(_pooling_head_kernel, num_heads=num_heads, eps=eps)

    out = pl.pallas_call(
        kernel,
        out_shape=jax.ShapeDtypeStruct((Bp, H), jnp.float32),
        grid_spec=pltpu.PrefetchScalarGridSpec(
            num_scalar_prefetch=0,
            grid=(n_blocks,),
            in_specs=in_specs,
            out_specs=out_spec,
        ),
        compiler_params=pltpu.CompilerParams(
            dimension_semantics=("parallel",),
            vmem_limit_bytes=vmem_limit,
        ),
        cost_estimate=cost,
    )(xb, wks, bsc, gt, wv_t, bv, wo_t, bo, lnw, lnb, w1_t, b1, w2_t, b2)

    return out[:B] if needs_pad else out


# ---------------------------------------------------------------------------
# Pure-JAX reference (PyTorch forward semantics) and parameter construction
# ---------------------------------------------------------------------------
def _reference(x, params, *, num_heads, eps):
    B, S, H = x.shape
    d = H // num_heads
    probe = jnp.broadcast_to(params["probe"], (B, 1, H))
    q = probe @ params["wq"].T + params["bq"]
    k = x @ params["wk"].T + params["bk"]
    v = x @ params["wv"].T + params["bv"]
    q = q.reshape(B, 1, num_heads, d).transpose(0, 2, 1, 3)
    k = k.reshape(B, S, num_heads, d).transpose(0, 2, 1, 3)
    v = v.reshape(B, S, num_heads, d).transpose(0, 2, 1, 3)
    scores = jnp.einsum("bhqd,bhkd->bhqk", q, k) / jnp.sqrt(jnp.float32(d))
    p = jax.nn.softmax(scores, axis=-1)
    ctx = jnp.einsum("bhqk,bhkd->bhqd", p, v)
    ctx = ctx.transpose(0, 2, 1, 3).reshape(B, 1, H)
    attn_out = ctx @ params["wo"].T + params["bo"]
    residual = attn_out
    mean = jnp.mean(attn_out, axis=-1, keepdims=True)
    var = jnp.mean(jnp.square(attn_out - mean), axis=-1, keepdims=True)
    ln = (attn_out - mean) / jnp.sqrt(var + eps) * params["ln_w"] + params["ln_b"]
    h1 = jax.nn.gelu(ln @ params["fc1_w"].T + params["fc1_b"], approximate=True)
    h2 = h1 @ params["fc2_w"].T + params["fc2_b"]
    return (residual + h2)[:, 0]


def make_params(key, hidden_size, inner_dim):
    ks = jax.random.split(key, 12)
    H, I = hidden_size, inner_dim
    s = 0.05
    return {
        "probe": jax.random.normal(ks[0], (1, H), jnp.float32),
        "wq": s * jax.random.normal(ks[1], (H, H), jnp.float32),
        "bq": s * jax.random.normal(ks[2], (1, H), jnp.float32),
        "wk": s * jax.random.normal(ks[3], (H, H), jnp.float32),
        "bk": s * jax.random.normal(ks[4], (1, H), jnp.float32),
        "wv": s * jax.random.normal(ks[5], (H, H), jnp.float32),
        "bv": s * jax.random.normal(ks[6], (1, H), jnp.float32),
        "wo": s * jax.random.normal(ks[7], (H, H), jnp.float32),
        "bo": s * jax.random.normal(ks[8], (1, H), jnp.float32),
        "ln_w": jnp.ones((1, H), jnp.float32),
        "ln_b": jnp.zeros((1, H), jnp.float32),
        "fc1_w": s * jax.random.normal(ks[9], (I, H), jnp.float32),
        "fc1_b": jnp.zeros((1, I), jnp.float32),
        "fc2_w": s * jax.random.normal(ks[10], (H, I), jnp.float32),
        "fc2_b": jnp.zeros((1, H), jnp.float32),
    }


if __name__ == "__main__":
    B, S, H = 2, 8, 32
    num_heads = 4
    inner_dim = 64
    eps = 1e-6

    key = jax.random.PRNGKey(0)
    kx, kp = jax.random.split(key)
    x = jax.random.normal(kx, (B, S, H), jnp.float32)
    params = make_params(kp, H, inner_dim)

    out = siglip_attention_pooling_head(x, params, num_heads=num_heads, eps=eps)
    out = jax.block_until_ready(out)
    assert out.shape == (B, H)

    ref = _reference(x, params, num_heads=num_heads, eps=eps)
    import numpy as np
    # Kernel runs with bf16 operands (f32 accumulation) + approx reciprocal.
    np.testing.assert_allclose(np.asarray(out), np.asarray(ref), rtol=4e-2, atol=4e-2)

    print("KERNEL_OK")
</pallas_src>

<mosaic_0001>
module attributes {stable_mosaic.version = 11 : i64} {
  func.func @k(%arg0: i32, %arg1: memref<8x128xf32, #tpu.memory_space<vmem>>, %arg2: memref<8x128xf32, #tpu.memory_space<vmem>>, %arg3: memref<8x128xf32, #tpu.memory_space<vmem>>) attributes {dimension_semantics = [#tpu.dimension_semantics<arbitrary>], iteration_bounds = array<i64: 2>, scalar_prefetch = 0 : i64, scratch_operands = 0 : i64, tpu.core_type = #tpu.core_type<tc>, window_params = [{transform_indices = @transform_0, window_bounds = array<i64: 8, 128>}, {pipeline_mode = #tpu.pipeline_mode<synchronous>, transform_indices = @transform_1, window_bounds = array<i64: 8, 128>}, {transform_indices = @transform_2, window_bounds = array<i64: 8, 128>}]} {
    %c0 = arith.constant 0 : index
    %c0_0 = arith.constant 0 : index
    %0 = vector.load %arg1[%c0, %c0_0] : memref<8x128xf32, #tpu.memory_space<vmem>>, vector<8x128xf32>
    %c0_1 = arith.constant 0 : index
    %c0_2 = arith.constant 0 : index
    %1 = vector.load %arg2[%c0_1, %c0_2] : memref<8x128xf32, #tpu.memory_space<vmem>>, vector<8x128xf32>
    %2 = arith.addf %0, %1 : vector<8x128xf32>
    %c0_3 = arith.constant 0 : index
    %c0_4 = arith.constant 0 : index
    %3 = vector.load %arg3[%c0_3, %c0_4] : memref<8x128xf32, #tpu.memory_space<vmem>>, vector<8x128xf32>
    tpu.vector_store %arg3[%c0_3, %c0_4], %2 {strides = array<i32>} : memref<8x128xf32, #tpu.memory_space<vmem>>, vector<8x128xf32>,
    return
  }
  func.func @transform_0(%arg0: i32) -> (i32, i32) {
    %c0_i32 = arith.constant 0 : i32
    %c0_i32_0 = arith.constant 0 : i32
    return %arg0, %c0_i32 : i32, i32
  }
  func.func @transform_1(%arg0: i32) -> (i32, i32) {
    %c0_i32 = arith.constant 0 : i32
    %c0_i32_0 = arith.constant 0 : i32
    %c0_i32_1 = arith.constant 0 : i32
    return %c0_i32, %c0_i32_0 : i32, i32
  }
  func.func @transform_2(%arg0: i32) -> (i32, i32) {
    %c0_i32 = arith.constant 0 : i32
    %c0_i32_0 = arith.constant 0 : i32
    return %arg0, %c0_i32 : i32, i32
  }
}

module attributes {stable_mosaic.version = 11 : i64} {
  func.func @_pooling_head_kernel(%arg0: i32, %arg1: memref<2x8x32xbf16, #tpu.memory_space<vmem>>, %arg2: memref<32x128xbf16, #tpu.memory_space<vmem>>, %arg3: memref<1x128xf32, #tpu.memory_space<vmem>>, %arg4: memref<4x32xf32, #tpu.memory_space<vmem>>, %arg5: memref<32x32xbf16, #tpu.memory_space<vmem>>, %arg6: memref<1x32xf32, #tpu.memory_space<vmem>>, %arg7: memref<32x32xbf16, #tpu.memory_space<vmem>>, %arg8: memref<1x32xf32, #tpu.memory_space<vmem>>, %arg9: memref<1x32xf32, #tpu.memory_space<vmem>>, %arg10: memref<1x32xf32, #tpu.memory_space<vmem>>, %arg11: memref<32x64xbf16, #tpu.memory_space<vmem>>, %arg12: memref<1x64xf32, #tpu.memory_space<vmem>>, %arg13: memref<64x32xbf16, #tpu.memory_space<vmem>>, %arg14: memref<1x32xf32, #tpu.memory_space<vmem>>, %arg15: memref<2x32xf32, #tpu.memory_space<vmem>>) attributes {dimension_semantics = [#tpu.dimension_semantics<parallel>], iteration_bounds = array<i64: 1>, scalar_prefetch = 0 : i64, scratch_operands = 0 : i64, tpu.core_type = #tpu.core_type<tc>, window_params = [{transform_indices = @transform_0, window_bounds = array<i64: 2, 8, 32>}, {pipeline_mode = #tpu.pipeline_mode<synchronous>, transform_indices = @transform_1, window_bounds = array<i64: 32, 128>}, {pipeline_mode = #tpu.pipeline_mode<synchronous>, transform_indices = @transform_2, window_bounds = array<i64: 1, 128>}, {pipeline_mode = #tpu.pipeline_mode<synchronous>, transform_indices = @transform_3, window_bounds = array<i64: 4, 32>}, {pipeline_mode = #tpu.pipeline_mode<synchronous>, transform_indices = @transform_4, window_bounds = array<i64: 32, 32>}, {pipeline_mode = #tpu.pipeline_mode<synchronous>, transform_indices = @transform_5, window_bounds = array<i64: 1, 32>}, {pipeline_mode = #tpu.pipeline_mode<synchronous>, transform_indices = @transform_6, window_bounds = array<i64: 32, 32>}, {pipeline_mode = #tpu.pipeline_mode<synchronous>, transform_indices = @transform_7, window_bounds = array<i64: 1, 32>}, {pipeline_mode = #tpu.pipeline_mode<synchronous>, transform_indices = @transform_8, window_bounds = array<i64: 1, 32>}, {pipeline_mode = #tpu.pipeline_mode<synchronous>, transform_indices = @transform_9, window_bounds = array<i64: 1, 32>}, {pipeline_mode = #tpu.pipeline_mode<synchronous>, transform_indices = @transform_10, window_bounds = array<i64: 32, 64>}, {pipeline_mode = #tpu.pipeline_mode<synchronous>, transform_indices = @transform_11, window_bounds = array<i64: 1, 64>}, {pipeline_mode = #tpu.pipeline_mode<synchronous>, transform_indices = @transform_12, window_bounds = array<i64: 64, 32>}, {pipeline_mode = #tpu.pipeline_mode<synchronous>, transform_indices = @transform_13, window_bounds = array<i64: 1, 32>}, {transform_indices = @transform_14, window_bounds = array<i64: 2, 32>}]} {
    %c0 = arith.constant 0 : index
    %c0_0 = arith.constant 0 : index
    %c0_1 = arith.constant 0 : index
    %0 = vector.load %arg1[%c0, %c0_0, %c0_1] : memref<2x8x32xbf16, #tpu.memory_space<vmem>>, vector<2x8x32xbf16>
    %1 = vector.shape_cast %0 : vector<2x8x32xbf16> to vector<16x32xbf16>
    %c0_2 = arith.constant 0 : index
    %c0_3 = arith.constant 0 : index
    %2 = vector.load %arg2[%c0_2, %c0_3] : memref<32x128xbf16, #tpu.memory_space<vmem>>, vector<32x128xbf16>
    %cst = arith.constant dense<0.000000e+00> : vector<16x128xf32>
    %3 = tpu.matmul %1, %2, %cst {dimension_numbers = #tpu.dot_dimension_numbers<[1], [0], [0], [1], [0, 0, 1, 1], [], []>} : vector<16x32xbf16>, vector<32x128xbf16>, vector<16x128xf32> -> vector<16x128xf32>
    %c0_4 = arith.constant 0 : index
    %c0_5 = arith.constant 0 : index
    %4 = vector.load %arg3[%c0_4, %c0_5] : memref<1x128xf32, #tpu.memory_space<vmem>>, vector<1x128xf32>
    %5 = vector.broadcast %4 : vector<1x128xf32> to vector<16x128xf32>
    %6 = arith.addf %3, %5 : vector<16x128xf32>
    %7 = vector.shape_cast %6 : vector<16x128xf32> to vector<2x8x128xf32>
    %8 = tpu.transpose %7, [0, 2, 1] : vector<2x8x128xf32> -> vector<2x128x8xf32>
    %9 = vector.extract_strided_slice %8 {offsets = [0, 0, 0], sizes = [2, 4, 8], strides = [1, 1, 1]} : vector<2x128x8xf32> to vector<2x4x8xf32>
    %cst_6 = arith.constant dense<0xFF800000> : vector<2x4xf32>
    %10 = vector.multi_reduction <maximumf>, %9, %cst_6 [2] : vector<2x4x8xf32> to vector<2x4xf32>
    %11 = vector.shape_cast %10 : vector<2x4xf32> to vector<2x4x1xf32>
    %12 = vector.broadcast %11 : vector<2x4x1xf32> to vector<2x4x8xf32>
    %13 = arith.subf %9, %12 : vector<2x4x8xf32>
    %14 = math.exp %13 : vector<2x4x8xf32>
    %cst_7 = arith.constant dense<0.000000e+00> : vector<2x4xf32>
    %15 = vector.multi_reduction <add>, %14, %cst_7 [2] : vector<2x4x8xf32> to vector<2x4xf32>
    %16 = vector.shape_cast %15 : vector<2x4xf32> to vector<2x4x1xf32>
    %17 = tpu.reciprocal %16 {approx = true} : vector<2x4x1xf32> -> vector<2x4x1xf32>
    %18 = vector.broadcast %17 : vector<2x4x1xf32> to vector<2x4x8xf32>
    %19 = arith.mulf %14, %18 : vector<2x4x8xf32>
    %20 = arith.truncf %19 : vector<2x4x8xf32> to vector<2x4x8xbf16>
    "tpu.trace_start"() <{level = 10 : i32, message = "bhs,bse->bhe"}> : () -> ()
    %cst_8 = arith.constant dense<0.000000e+00> : vector<2x4x32xf32>
    %21 = tpu.matmul %20, %0, %cst_8 {dimension_numbers = #tpu.dot_dimension_numbers<[2], [1], [1], [2], [0, 0, 0, 1, 1, 2], [0], [0]>} : vector<2x4x8xbf16>, vector<2x8x32xbf16>, vector<2x4x32xf32> -> vector<2x4x32xf32>
    "tpu.trace_stop"() : () -> ()
    %22 = vector.shape_cast %21 : vector<2x4x32xf32> to vector<8x32xf32>
    %23 = arith.truncf %22 : vector<8x32xf32> to vector<8x32xbf16>
    %c0_9 = arith.constant 0 : index
    %c0_10 = arith.constant 0 : index
    %24 = vector.load %arg5[%c0_9, %c0_10] : memref<32x32xbf16, #tpu.memory_space<vmem>>, vector<32x32xbf16>
    %cst_11 = arith.constant dense<0.000000e+00> : vector<8x32xf32>
    %25 = tpu.matmul %23, %24, %cst_11 {dimension_numbers = #tpu.dot_dimension_numbers<[1], [0], [0], [1], [0, 0, 1, 1], [], []>} : vector<8x32xbf16>, vector<32x32xbf16>, vector<8x32xf32> -> vector<8x32xf32>
    %26 = vector.shape_cast %25 : vector<8x32xf32> to vector<2x4x32xf32>
    %c0_12 = arith.constant 0 : index
    %c0_13 = arith.constant 0 : index
    %27 = vector.load %arg4[%c0_12, %c0_13] : memref<4x32xf32, #tpu.memory_space<vmem>>, vector<4x32xf32>
    %28 = vector.shape_cast %27 : vector<4x32xf32> to vector<1x4x32xf32>
    %29 = vector.broadcast %28 : vector<1x4x32xf32> to vector<2x4x32xf32>
    %30 = arith.mulf %26, %29 : vector<2x4x32xf32>
    %cst_14 = arith.constant dense<0.000000e+00> : vector<2x32xf32>
    %31 = vector.multi_reduction <add>, %30, %cst_14 [1] : vector<2x4x32xf32> to vector<2x32xf32>
    %c0_15 = arith.constant 0 : index
    %c0_16 = arith.constant 0 : index
    %32 = vector.load %arg6[%c0_15, %c0_16] : memref<1x32xf32, #tpu.memory_space<vmem>>, vector<1x32xf32>
    %33 = vector.broadcast %32 : vector<1x32xf32> to vector<2x32xf32>
    %34 = arith.addf %31, %33 : vector<2x32xf32>
    %35 = arith.truncf %34 : vector<2x32xf32> to vector<2x32xbf16>
    %c0_17 = arith.constant 0 : index
    %c0_18 = arith.constant 0 : index
    %36 = vector.load %arg7[%c0_17, %c0_18] : memref<32x32xbf16, #tpu.memory_space<vmem>>, vector<32x32xbf16>
    %cst_19 = arith.constant dense<0.000000e+00> : vector<2x32xf32>
    %37 = tpu.matmul %35, %36, %cst_19 {dimension_numbers = #tpu.dot_dimension_numbers<[1], [0], [0], [1], [0, 0, 1, 1], [], []>} : vector<2x32xbf16>, vector<32x32xbf16>, vector<2x32xf32> -> vector<2x32xf32>
    %c0_20 = arith.constant 0 : index
    %c0_21 = arith.constant 0 : index
    %38 = vector.load %arg8[%c0_20, %c0_21] : memref<1x32xf32, #tpu.memory_space<vmem>>, vector<1x32xf32>
    %39 = vector.broadcast %38 : vector<1x32xf32> to vector<2x32xf32>
    %40 = arith.addf %37, %39 : vector<2x32xf32>
    %cst_22 = arith.constant dense<0.000000e+00> : vector<2xf32>
    %41 = vector.multi_reduction <add>, %40, %cst_22 [1] : vector<2x32xf32> to vector<2xf32>
    %42 = vector.shape_cast %41 : vector<2xf32> to vector<2x1xf32>
    %cst_23 = arith.constant 3.200000e+01 : f32
    %43 = vector.broadcast %cst_23 : f32 to vector<2x1xf32>
    %44 = arith.divf %42, %43 : vector<2x1xf32>
    %45 = vector.broadcast %44 : vector<2x1xf32> to vector<2x32xf32>
    %46 = arith.subf %40, %45 : vector<2x32xf32>
    %47 = arith.mulf %46, %46 : vector<2x32xf32>
    %cst_24 = arith.constant dense<0.000000e+00> : vector<2xf32>
    %48 = vector.multi_reduction <add>, %47, %cst_24 [1] : vector<2x32xf32> to vector<2xf32>
    %49 = vector.shape_cast %48 : vector<2xf32> to vector<2x1xf32>
    %cst_25 = arith.constant 3.200000e+01 : f32
    %50 = vector.broadcast %cst_25 : f32 to vector<2x1xf32>
    %51 = arith.divf %49, %50 : vector<2x1xf32>
    %52 = vector.broadcast %44 : vector<2x1xf32> to vector<2x32xf32>
    %53 = arith.subf %40, %52 : vector<2x32xf32>
    %cst_26 = arith.constant 9.99999997E-7 : f32
    %54 = vector.broadcast %cst_26 : f32 to vector<2x1xf32>
    %55 = arith.addf %51, %54 : vector<2x1xf32>
    %56 = math.rsqrt %55 : vector<2x1xf32>
    %57 = vector.broadcast %56 : vector<2x1xf32> to vector<2x32xf32>
    %58 = arith.mulf %53, %57 : vector<2x32xf32>
    %c0_27 = arith.constant 0 : index
    %c0_28 = arith.constant 0 : index
    %59 = vector.load %arg9[%c0_27, %c0_28] : memref<1x32xf32, #tpu.memory_space<vmem>>, vector<1x32xf32>
    %60 = vector.broadcast %59 : vector<1x32xf32> to vector<2x32xf32>
    %61 = arith.mulf %58, %60 : vector<2x32xf32>
    %c0_29 = arith.constant 0 : index
    %c0_30 = arith.constant 0 : index
    %62 = vector.load %arg10[%c0_29, %c0_30] : memref<1x32xf32, #tpu.memory_space<vmem>>, vector<1x32xf32>
    %63 = vector.broadcast %62 : vector<1x32xf32> to vector<2x32xf32>
    %64 = arith.addf %61, %63 : vector<2x32xf32>
    %65 = arith.truncf %64 : vector<2x32xf32> to vector<2x32xbf16>
    %c0_31 = arith.constant 0 : index
    %c0_32 = arith.constant 0 : index
    %66 = vector.load %arg11[%c0_31, %c0_32] : memref<32x64xbf16, #tpu.memory_space<vmem>>, vector<32x64xbf16>
    %cst_33 = arith.constant dense<0.000000e+00> : vector<2x64xf32>
    %67 = tpu.matmul %65, %66, %cst_33 {dimension_numbers = #tpu.dot_dimension_numbers<[1], [0], [0], [1], [0, 0, 1, 1], [], []>} : vector<2x32xbf16>, vector<32x64xbf16>, vector<2x64xf32> -> vector<2x64xf32>
    %c0_34 = arith.constant 0 : index
    %c0_35 = arith.constant 0 : index
    %68 = vector.load %arg12[%c0_34, %c0_35] : memref<1x64xf32, #tpu.memory_space<vmem>>, vector<1x64xf32>
    %69 = vector.broadcast %68 : vector<1x64xf32> to vector<2x64xf32>
    %70 = arith.addf %67, %69 : vector<2x64xf32>
    %71 = arith.mulf %70, %70 : vector<2x64xf32>
    %72 = arith.mulf %70, %71 : vector<2x64xf32>
    %cst_36 = arith.constant 4.471500e-02 : f32
    %73 = vector.broadcast %cst_36 : f32 to vector<2x64xf32>
    %74 = arith.mulf %73, %72 : vector<2x64xf32>
    %75 = arith.addf %70, %74 : vector<2x64xf32>
    %cst_37 = arith.constant 0.797884583 : f32
    %76 = vector.broadcast %cst_37 : f32 to vector<2x64xf32>
    %77 = arith.mulf %76, %75 : vector<2x64xf32>
    %78 = math.tanh %77 : vector<2x64xf32>
    %cst_38 = arith.constant 1.000000e+00 : f32
    %79 = vector.broadcast %cst_38 : f32 to vector<2x64xf32>
    %80 = arith.addf %79, %78 : vector<2x64xf32>
    %cst_39 = arith.constant 5.000000e-01 : f32
    %81 = vector.broadcast %cst_39 : f32 to vector<2x64xf32>
    %82 = arith.mulf %81, %80 : vector<2x64xf32>
    %83 = arith.mulf %70, %82 : vector<2x64xf32>
    %84 = arith.truncf %83 : vector<2x64xf32> to vector<2x64xbf16>
    %c0_40 = arith.constant 0 : index
    %c0_41 = arith.constant 0 : index
    %85 = vector.load %arg13[%c0_40, %c0_41] : memref<64x32xbf16, #tpu.memory_space<vmem>>, vector<64x32xbf16>
    %cst_42 = arith.constant dense<0.000000e+00> : vector<2x32xf32>
    %86 = tpu.matmul %84, %85, %cst_42 {dimension_numbers = #tpu.dot_dimension_numbers<[1], [0], [0], [1], [0, 0, 1, 1], [], []>} : vector<2x64xbf16>, vector<64x32xbf16>, vector<2x32xf32> -> vector<2x32xf32>
    %c0_43 = arith.constant 0 : index
    %c0_44 = arith.constant 0 : index
    %87 = vector.load %arg14[%c0_43, %c0_44] : memref<1x32xf32, #tpu.memory_space<vmem>>, vector<1x32xf32>
    %88 = vector.broadcast %87 : vector<1x32xf32> to vector<2x32xf32>
    %89 = arith.addf %86, %88 : vector<2x32xf32>
    %90 = arith.addf %40, %89 : vector<2x32xf32>
    %c0_45 = arith.constant 0 : index
    %c0_46 = arith.constant 0 : index
    %91 = vector.load %arg15[%c0_45, %c0_46] : memref<2x32xf32, #tpu.memory_space<vmem>>, vector<2x32xf32>
    tpu.vector_store %arg15[%c0_45, %c0_46], %90 {strides = array<i32>} : memref<2x32xf32, #tpu.memory_space<vmem>>, vector<2x32xf32>,
    return
  }
  func.func @transform_0(%arg0: i32) -> (i32, i32, i32) {
    %c0_i32 = arith.constant 0 : i32
    %c0_i32_0 = arith.constant 0 : i32
    %c0_i32_1 = arith.constant 0 : i32
    return %arg0, %c0_i32, %c0_i32_0 : i32, i32, i32
  }
  func.func @transform_1(%arg0: i32) -> (i32, i32) {
    %c0_i32 = arith.constant 0 : i32
    %c0_i32_0 = arith.constant 0 : i32
    %c0_i32_1 = arith.constant 0 : i32
    return %c0_i32, %c0_i32_0 : i32, i32
  }
  func.func @transform_2(%arg0: i32) -> (i32, i32) {
    %c0_i32 = arith.constant 0 : i32
    %c0_i32_0 = arith.constant 0 : i32
    %c0_i32_1 = arith.constant 0 : i32
    return %c0_i32, %c0_i32_0 : i32, i32
  }
  func.func @transform_3(%arg0: i32) -> (i32, i32) {
    %c0_i32 = arith.constant 0 : i32
    %c0_i32_0 = arith.constant 0 : i32
    %c0_i32_1 = arith.constant 0 : i32
    return %c0_i32, %c0_i32_0 : i32, i32
  }
  func.func @transform_4(%arg0: i32) -> (i32, i32) {
    %c0_i32 = arith.constant 0 : i32
    %c0_i32_0 = arith.constant 0 : i32
    %c0_i32_1 = arith.constant 0 : i32
    return %c0_i32, %c0_i32_0 : i32, i32
  }
  func.func @transform_5(%arg0: i32) -> (i32, i32) {
    %c0_i32 = arith.constant 0 : i32
    %c0_i32_0 = arith.constant 0 : i32
    %c0_i32_1 = arith.constant 0 : i32
    return %c0_i32, %c0_i32_0 : i32, i32
  }
  func.func @transform_6(%arg0: i32) -> (i32, i32) {
    %c0_i32 = arith.constant 0 : i32
    %c0_i32_0 = arith.constant 0 : i32
    %c0_i32_1 = arith.constant 0 : i32
    return %c0_i32, %c0_i32_0 : i32, i32
  }
  func.func @transform_7(%arg0: i32) -> (i32, i32) {
    %c0_i32 = arith.constant 0 : i32
    %c0_i32_0 = arith.constant 0 : i32
    %c0_i32_1 = arith.constant 0 : i32
    return %c0_i32, %c0_i32_0 : i32, i32
  }
  func.func @transform_8(%arg0: i32) -> (i32, i32) {
    %c0_i32 = arith.constant 0 : i32
    %c0_i32_0 = arith.constant 0 : i32
    %c0_i32_1 = arith.constant 0 : i32
    return %c0_i32, %c0_i32_0 : i32, i32
  }
  func.func @transform_9(%arg0: i32) -> (i32, i32) {
    %c0_i32 = arith.constant 0 : i32
    %c0_i32_0 = arith.constant 0 : i32
    %c0_i32_1 = arith.constant 0 : i32
    return %c0_i32, %c0_i32_0 : i32, i32
  }
  func.func @transform_10(%arg0: i32) -> (i32, i32) {
    %c0_i32 = arith.constant 0 : i32
    %c0_i32_0 = arith.constant 0 : i32
    %c0_i32_1 = arith.constant 0 : i32
    return %c0_i32, %c0_i32_0 : i32, i32
  }
  func.func @transform_11(%arg0: i32) -> (i32, i32) {
    %c0_i32 = arith.constant 0 : i32
    %c0_i32_0 = arith.constant 0 : i32
    %c0_i32_1 = arith.constant 0 : i32
    return %c0_i32, %c0_i32_0 : i32, i32
  }
  func.func @transform_12(%arg0: i32) -> (i32, i32) {
    %c0_i32 = arith.constant 0 : i32
    %c0_i32_0 = arith.constant 0 : i32
    %c0_i32_1 = arith.constant 0 : i32
    return %c0_i32, %c0_i32_0 : i32, i32
  }
  func.func @transform_13(%arg0: i32) -> (i32, i32) {
    %c0_i32 = arith.constant 0 : i32
    %c0_i32_0 = arith.constant 0 : i32
    %c0_i32_1 = arith.constant 0 : i32
    return %c0_i32, %c0_i32_0 : i32, i32
  }
  func.func @transform_14(%arg0: i32) -> (i32, i32) {
    %c0_i32 = arith.constant 0 : i32
    %c0_i32_0 = arith.constant 0 : i32
    return %arg0, %c0_i32 : i32, i32
  }
}

</mosaic_0001>

<bundles_post_ra>
// kernel: tpu_custom_call.1
= control target key start
LH: loop header
LB: loop body
LE: loop exit
PB: predicated region body
PF: predicated region fallthrough
CT: control target
= control target key end

     0   :  { %7 = vsyncpa [#allocation3], 0  ;;  %s649_s0 = inlined_call_operand.hbm [shape: f32[16,128], index: 0, kind: input, shape index: {}]   ;;  %s650_s1 = inlined_call_operand.hbm [shape: f32[8,128], index: 1, kind: input, shape index: {}]   ;;  %s651_s2 = inlined_call_operand.hbm [shape: f32[16,128], index: 2, kind: output, shape index: {}]  }
   0x1   :  { %9 = vsyncpa [#allocation3 + $0x1], 0 }
   0x2   :  { %10 = vsyncpa [#allocation6], 0 }
   0x3   :  { %11 = vsyncpa [#allocation4], 0 }
   0x4   :  { %13 = vsyncpa [#allocation4 + $0x1], 0  ;;  %s483_s9 = smov 0   ;;  %s485_s10 = smov 0  }
   0x5   :  { %s487_s11 = smov 0   ;;  %s489_s12 = smov 0  }
   0x6 LB: > { %s504_s13 = sadd.s32 4294967295, %s463_s12   ;;  %s270_s14 = sadd.s32 4294967294, %s463_s12   ;;  %s463_s12 = sphi %s489_s12, %s674_s12   ;;  %s459_s11 = sphi %s487_s11, %s673_s11   ;;  %s455_s10 = sphi %s485_s10, %s672_s10   ;;  %s451_s9 = sphi %s483_s9, %s671_s9  }
   0x7   : > { %p39_p0 = scmp.ne.s32.totalorder %s455_s10, %s451_s9  ;;  %p652_p1 = scmp.eq.s32.totalorder %s504_s13, 0 }
   0x8   : > { %p90_p3 = scmp.eq.s32.totalorder %s270_s14, 1  ;;  %p271_p5 = scmp.ge.s32.totalorder %s463_s12, 1 }
   0x9   : > { %p513_p4 = por %p652_p1, %p39_p0  ;;  %p97_p7 = scmp.lt.s32.totalorder %s463_s12, 3 }
   0xa   : > { %p518_p6 = por %p90_p3, %p39_p0  ;;  %s465_s18 = smov [#allocation5]  }
   0xb   : > { %s656_s15 = scalar_select %p513_p4, 1, 0 }
   0xc   : > { %s657_s16 = scalar_select %p518_p6, 1, 0 }
   0xd   : > { %p523_p8 = pnand %p271_p5, %p97_p7  ;;  %s110_s19 = sshll.u32 %s465_s18, 4  ;;  %s111_s19 = int_to_ptr.vmem [resolvable:$true] %s110_s19 }
   0xe   : > { %s531_s20 = sadd.s32 1, %s463_s12   ;;  %s26_s24 = sadd.s32 1, %s459_s11 }
   0xf   : > { %s658_s17 = scalar_select %p523_p8, 1, 0 }
  0x10   : > { %p292_p10 = pneg %p523_p8  ;;  %s23_s22 = ssub.s32 %s463_s12, %s531_s20 }
  0x11   : > { %p541_p12 = scmp.eq.s32.totalorder %s23_s22, 0  ;;  %p33_p13 = scmp.ne.s32.totalorder %s459_s11, %s455_s10 }
  0x12   : > { %p535_p11 = pnand %p292_p10, %p652_p1  ;;  %s352_s25 = scalar_lea.vmem %s111_s19, 128 }
  0x13   : > { %p353_p3 = scmp.ne.s32.totalorder %s111_s19, %s352_s25  ;;  %p360_p9 = scmp.lt.s32.totalorder %s111_s19, %s111_s19 }
  0x14   : > { %p343_p0 = pneg %p535_p11  ;;  %p361_p2 = scmp.lt.s32.totalorder %s352_s25, %s352_s25 }
  0x16   : > { %p355_p5 = pnand %p353_p3, %p343_p0  ;;  %p362_p10 = por %p361_p2, %p360_p9 }
  0x18   : > { %p356_p7 = pneg %p355_p5 }
  0x1a   : > { %p363_p1 = pnand %p362_p10, %p356_p7 }
  0x1c   : > { %366 = shalt.err (!%p363_p1)
}
  0x1d   : > { %295 = dma.hbm_to_vmem [thread:$0]  (!%p535_p11), %s650_s1, 128, %s111_s19, [#allocation6]  }
  0x1e   : > { %s558_s28 = scalar_select %p541_p12, %s459_s11, %s26_s24  }
  0x1f   : > { %p34_p1 = scmp.eq.s32.totalorder %s463_s12, 0  ;;  %p661_p2 = scmp.eq.s32.totalorder %s504_s13, 1 }
  0x20   : > { %p305_p0 = scmp.lt.s32.totalorder %s463_s12, 2  ;;  %s121_s30 = sand.u32 1, %s459_s11  }
  0x21   : > { %p566_p9 = por %p661_p2, %p33_p13  ;;  %p35_p3 = por %p34_p1, %p33_p13 }
  0x22   : > { %s274_s3 = sshll.u32 %s121_s30, 3  ;;  %s275_s4 = sshll.u32 %s463_s12, 7 }
  0x23   : > { %s662_s29 = scalar_select %p566_p9, 1, 0 }
  0x24   : > { %s579_s7 = scalar_lea.hbm %s649_s0, %s275_s4  ;;  %s125_s8 = scalar_lea.vmem [#allocation2], %s274_s3 }
  0x25   : > { %s132_s14 = sshll.u32 %s125_s8, 4  ;;  %p581_p11 = pnand %p305_p0, %p35_p3  ;;  %s133_s14 = int_to_ptr.vmem [resolvable:$true] %s132_s14 }
  0x26   : > { %s122_s19 = scalar_lea.sflag [#allocation3], %s121_s30  ;;  %s367_s21 = scalar_lea.hbm %s579_s7, 128 }
  0x27   : > { %p368_p12 = scmp.ne.s32.totalorder %s579_s7, %s367_s21  ;;  %p369_p13 = pneg %p581_p11 }
  0x28   : > { %s372_s24 = scalar_lea.hbm %s649_s0, 256  ;;  %p373_p10 = scmp.lt.s32.totalorder %s579_s7, %s649_s0 }
  0x29   : > { %p370_p5 = pnand %p369_p13, %p368_p12  ;;  %p374_p1 = scmp.lt.s32.totalorder %s372_s24, %s367_s21 }
  0x2b   : > { %p371_p7 = pneg %p370_p5  ;;  %p375_p2 = por %p374_p1, %p373_p10 }
  0x2d   : > { %p376_p0 = pnand %p375_p2, %p371_p7 }
  0x2f   : > { %379 = shalt.err (!%p376_p0)
}
  0x30   : > { %s380_s27 = scalar_lea.vmem %s133_s14, 128  ;;  %s466_s30 = smov [#allocation2]  }
  0x31   : > { %p381_p3 = scmp.ne.s32.totalorder %s133_s14, %s380_s27  ;;  %s385_s3 = sshll.u32 %s466_s30, 4  ;;  %s386_s3 = int_to_ptr.vmem [resolvable:$false] %s385_s3 }
  0x32   : > { %s387_s4 = scalar_lea.vmem %s386_s3, 256  ;;  %p388_p12 = scmp.lt.s32.totalorder %s133_s14, %s386_s3 }
  0x33   : > { %p383_p6 = pnand %p381_p3, %p369_p13  ;;  %p389_p5 = scmp.lt.s32.totalorder %s387_s4, %s380_s27 }
  0x35   : > { %p384_p9 = pneg %p383_p6  ;;  %p390_p4 = por %p389_p5, %p388_p12 }
  0x37   : > { %p391_p8 = pnand %p390_p4, %p384_p9 }
  0x39   : > { %394 = shalt.err (!%p391_p8)
}
  0x3a   : > { %299 = dma.hbm_to_vmem [thread:$0]  (!%p581_p11), %s579_s7, 128, %s133_s14, %s122_s19  }
  0x3b   : > { %p664_p7 = scmp.ne.s32.totalorder %s658_s17, 0 }
  0x3c   : > { %s602_s5 = sand.u32 (!%p664_p7), 1, %s455_s10   ;;  %p665_p6 = scmp.ne.s32.totalorder (!%p664_p7), %s656_s15, 0 }
  0x3d   : > { %141 = sbr.rel (%p664_p7) target bundleno = 95 (0x5f), region = 28  ;;  %s277_s6 = sshll.u32 (!%p664_p7), %s602_s5, 3 }
  0x3e   : > { %s144_s8 = scalar_lea.sflag (!%p664_p7), [#allocation3], %s602_s5  ;;  %s147_s21 = scalar_lea.vmem (!%p664_p7), [#allocation2], %s277_s6 }
  0x42   : > { %438 = dma.done.wait (%p665_p6), %s144_s8, 128  }
  0x43   : > { %440 = vsyncadd (%p665_p6), %s144_s8, 4294967168  ;;  %p666_p4 = scmp.eq.s32.totalorder %s504_s13, 0 }
  0x45   : > { %442 = dma.done.wait (%p666_p4), [#allocation6], 128   ;;  %p667_p8 = pmov %p666_p4 }
  0x46   : > { %s171_s17 = scalar_lea.vmem [#allocation7], %s277_s6  ;;  %s281_s14 = sshll.u32 %s504_s13, 7  ;;  %v172_v0 = vld [vmem:[%s147_s21] sm:$0xff]  ;;  %v173_v1 = vld [vmem:[#allocation5] sm:$0xff] }
  0x47   : > { %444 = vsyncadd (%p667_p8), [#allocation6], 4294967168  ;;  %s190_s7 = sshll.u32 %s171_s17, 4  ;;  %v174_v2 = vadd.f32 %v173_v1, %v172_v0  ;;  %s188_s15 = scalar_lea.hbm %s651_s2, %s281_s14  ;;  %s191_s7 = int_to_ptr.vmem [resolvable:$true] %s190_s7 }
  0x48   : > { %s177_s22 = scalar_lea.sflag [#allocation4], %s602_s5  ;;  %s395_s23 = scalar_lea.vmem %s191_s7, 128 }
  0x49   : > { %175 = vst [vmem:[%s171_s17] sm:$0xff] %v174_v2  ;;  %p396_p9 = scmp.ne.s32.totalorder %s191_s7, %s395_s23  ;;  %p668_p11 = scmp.ne.s32.totalorder %s662_s29, 0 }
  0x4a   : > { %s467_s24 = smov [#allocation7]  }
  0x4b   : > { %p397_p13 = pnand %p396_p9, %p668_p11  ;;  %s399_s25 = sshll.u32 %s467_s24, 4  ;;  %s400_s25 = int_to_ptr.vmem [resolvable:$false] %s399_s25 }
  0x4c   : > { %s401_s26 = scalar_lea.vmem %s400_s25, 256  ;;  %p402_p1 = scmp.lt.s32.totalorder %s191_s7, %s400_s25 }
  0x4d   : > { %p398_p10 = pneg %p397_p13  ;;  %p403_p2 = scmp.lt.s32.totalorder %s401_s26, %s395_s23 }
  0x4f   : > { %p404_p0 = por %p403_p2, %p402_p1 }
  0x51   : > { %p405_p3 = pnand %p404_p0, %p398_p10 }
  0x53   : > { %408 = shalt.err (!%p405_p3)
}
  0x54   : > { %s409_s13 = scalar_lea.hbm %s188_s15, 128  ;;  %s413_s3 = scalar_lea.hbm %s651_s2, 256 }
  0x55   : > { %p410_p12 = scmp.ne.s32.totalorder %s188_s15, %s409_s13  ;;  %p414_p6 = scmp.lt.s32.totalorder %s188_s15, %s651_s2 }
  0x56   : > { %p415_p4 = scmp.lt.s32.totalorder %s413_s3, %s409_s13 }
  0x57   : > { %p411_p5 = pnand %p410_p12, %p668_p11 }
  0x58   : > { %p416_p8 = por %p415_p4, %p414_p6 }
  0x59   : > { %p412_p7 = pneg %p411_p5 }
  0x5b   : > { %p417_p9 = pnand %p416_p8, %p412_p7 }
  0x5d   : > { %420 = shalt.err (!%p417_p9)
}
  0x5e   : > { %290 = dma.vmem_to_hbm [thread:$0]  (%p668_p11), %s191_s7, 128, %s188_s15, %s177_s22  }
  0x5f PF: > { %s202_s6 = sand.u32 1, %s451_s9   ;;  %p669_p13 = scmp.ne.s32.totalorder %s657_s16, 0 }
  0x60   : > { %p670_p10 = scmp.ge.s32.totalorder %s463_s12, 2  ;;  %s203_s8 = scalar_lea.sflag [#allocation4], %s202_s6 }
  0x62   : > { %p301_p1 = pnand %p670_p10, %p669_p13 }
  0x64   : > { %p302_p2 = pneg %p301_p1 }
  0x66   : > { %446 = dma.done.wait (%p302_p2), %s203_s8, 128  }
  0x67   : > { %448 = vsyncadd (%p302_p2), %s203_s8, 4294967168  ;;  %p16_p0 = scmp.ge.s32.totalorder %s531_s20, 4   ;;  %s671_s9 = smov %s455_s10 }
  0x68   : > { %s672_s10 = smov %s459_s11  ;;  %s673_s11 = smov %s558_s28 }
  0x69   : > { %s674_s12 = smov %s531_s20  ;;  %18 = sbr.rel (!%p16_p0) target bundleno = 6 (0x6), region = 77 }
  0x6e   :  { %208 = vsyncpa [#allocation3], 1 }
  0x6f   :  { %210 = vsyncpa [#allocation3 + $0x1], 1 }
  0x70   :  { %211 = vsyncpa [#allocation6], 1 }
  0x71   :  { %212 = vsyncpa [#allocation4], 1 }
  0x72   :  { %214 = vsyncpa [#allocation4 + $0x1], 1 }

// kernel: tpu_custom_call.1
= control target key start
LH: loop header
LB: loop body
LE: loop exit
PB: predicated region body
PF: predicated region fallthrough
CT: control target
= control target key end

     0   :  { %19 = vsyncpa [#allocation3], 0  ;;  %s1279_s0 = inlined_call_operand.hbm [shape: bf16[2,8,32], index: 0, kind: input, shape index: {}]   ;;  %s1280_s1 = inlined_call_operand.vmem [shape: bf16[32,128], index: 1, kind: input, shape index: {}]   ;;  %s1281_s2 = inlined_call_operand.hbm [shape: f32[1,128], index: 2, kind: input, shape index: {}]   ;;  %s1282_s3 = inlined_call_operand.hbm [shape: f32[4,32], index: 3, kind: input, shape index: {}]   ;;  %s1283_s4 = inlined_call_operand.vmem [shape: bf16[32,32], index: 4, kind: input, shape index: {}]   ;;  %s1284_s5 = inlined_call_operand.hbm [shape: f32[1,32], index: 5, kind: input, shape index: {}]   ;;  %s1285_s6 = inlined_call_operand.vmem [shape: bf16[32,32], index: 6, kind: input, shape index: {}]   ;;  %s1286_s7 = inlined_call_operand.hbm [shape: f32[1,32], index: 7, kind: input, shape index: {}]   ;;  %s1287_s8 = inlined_call_operand.hbm [shape: f32[1,32], index: 8, kind: input, shape index: {}]   ;;  %s1288_s9 = inlined_call_operand.hbm [shape: f32[1,32], index: 9, kind: input, shape index: {}]   ;;  %s1289_s10 = inlined_call_operand.vmem [shape: bf16[32,64], index: 10, kind: input, shape index: {}]   ;;  %s1290_s11 = inlined_call_operand.vmem [shape: f32[1,64], index: 11, kind: input, shape index: {}]   ;;  %s1291_s12 = inlined_call_operand.vmem [shape: bf16[64,32], index: 12, kind: input, shape index: {}]   ;;  %s1292_s13 = inlined_call_operand.vmem [shape: f32[1,32], index: 13, kind: input, shape index: {}]   ;;  %s1293_s14 = inlined_call_operand.hbm [shape: f32[2,32], index: 14, kind: output, shape index: {}]  }
   0x1   :  { %20 = vsyncpa [#allocation6], 0 }
   0x2   :  { %21 = vsyncpa [#allocation9], 0 }
   0x3   :  { %22 = vsyncpa [#allocation12], 0 }
   0x4   :  { %23 = vsyncpa [#allocation4], 0  ;;  %s1082_s29 = smov [#allocation5]   ;;  %s1083_s15 = smov [#allocation8]  }
   0x5   :  { %s44_s30 = sshll.u32 %s1082_s29, 4  ;;  %s66_s16 = sshll.u32 %s1083_s15, 4  ;;  %s45_s30 = int_to_ptr.vmem [resolvable:$true] %s44_s30  ;;  %s67_s16 = int_to_ptr.vmem [resolvable:$true] %s66_s16 }
   0x6   :  { %s920_s17 = scalar_lea.vmem %s45_s30, 16  ;;  %s924_s18 = scalar_lea.vmem %s45_s30, 32 }
   0x7   :  { %p921_p0 = scmp.ne.s32.totalorder %s45_s30, %s920_s17  ;;  %p925_p1 = scmp.lt.s32.totalorder %s45_s30, %s45_s30 }
   0x8   :  { %p926_p2 = scmp.lt.s32.totalorder %s924_s18, %s920_s17 }
   0xa   :  { %p927_p3 = por %p926_p2, %p925_p1 }
   0xc   :  { %p928_p4 = pnand %p927_p3, %p921_p0 }
   0xe   :  { %931 = shalt.err (!%p928_p4)
}
   0xf   :  { %47 = dma.hbm_to_vmem [thread:$0]  %s1281_s2, 16, %s45_s30, [#allocation6]  }
  0x10   :  { %s940_s21 = scalar_lea.vmem %s67_s16, 16  ;;  %s944_s22 = scalar_lea.vmem %s67_s16, 32 }
  0x11   :  { %p941_p5 = scmp.ne.s32.totalorder %s67_s16, %s940_s21  ;;  %p945_p6 = scmp.lt.s32.totalorder %s67_s16, %s67_s16 }
  0x12   :  { %p946_p7 = scmp.lt.s32.totalorder %s944_s22, %s940_s21 }
  0x14   :  { %p947_p8 = por %p946_p7, %p945_p6 }
  0x16   :  { %p948_p9 = pnand %p947_p8, %p941_p5 }
  0x18   :  { %951 = shalt.err (!%p948_p9)
}
  0x19   :  { %69 = dma.hbm_to_vmem [thread:$0]  %s1284_s5, 16, %s67_s16, [#allocation9]  }
  0x1a   :  { %s1084_s25 = smov [#allocation11]   ;;  %s1085_s27 = smov [#allocation2]  }
  0x1b   :  { %s88_s26 = sshll.u32 %s1084_s25, 4  ;;  %s29_s28 = sshll.u32 %s1085_s27, 4  ;;  %s89_s26 = int_to_ptr.vmem [resolvable:$true] %s88_s26  ;;  %s30_s28 = int_to_ptr.vmem [resolvable:$true] %s29_s28 }
  0x1c   :  { %s960_s29 = scalar_lea.vmem %s89_s26, 16  ;;  %s964_s2 = scalar_lea.vmem %s89_s26, 32 }
  0x1d   :  { %p961_p10 = scmp.ne.s32.totalorder %s89_s26, %s960_s29  ;;  %p965_p11 = scmp.lt.s32.totalorder %s89_s26, %s89_s26 }
  0x1e   :  { %p966_p12 = scmp.lt.s32.totalorder %s964_s2, %s960_s29 }
  0x20   :  { %p967_p13 = por %p966_p12, %p965_p11 }
  0x22   :  { %p968_p0 = pnand %p967_p13, %p961_p10 }
  0x24   :  { %971 = shalt.err (!%p968_p0)
}
  0x25   :  { %91 = dma.hbm_to_vmem [thread:$0]  %s1287_s8, 16, %s89_s26, [#allocation12]  }
  0x26   :  { %s980_s17 = scalar_lea.vmem %s30_s28, 128  ;;  %p985_p2 = scmp.lt.s32.totalorder %s30_s28, %s30_s28 }
  0x27   :  { %p981_p1 = scmp.ne.s32.totalorder %s30_s28, %s980_s17  ;;  %p986_p3 = scmp.lt.s32.totalorder %s980_s17, %s980_s17 }
  0x29   :  { %p987_p4 = por %p986_p3, %p985_p2 }
  0x2b   :  { %p988_p5 = pnand %p987_p4, %p981_p1 }
  0x2d   :  { %991 = shalt.err (!%p988_p5)
}
  0x2e   :  { %s1086_s5 = smov 64   ;;  %s1087_s16 = smov 4  }
  0x2f   :  { %35 = dma.hbm_to_vmem [thread:$0]  %s1279_s0, 128, %s30_s28, [#allocation3], %s1086_s5, %s1086_s5, %s1087_s16  }
  0x30   :  { %s1088_s20 = smov [#allocation7]   ;;  %s1089_s22 = smov [#allocation10]  }
  0x31   :  { %s54_s21 = sshll.u32 %s1088_s20, 4  ;;  %s78_s23 = sshll.u32 %s1089_s22, 4  ;;  %s55_s21 = int_to_ptr.vmem [resolvable:$true] %s54_s21  ;;  %s79_s23 = int_to_ptr.vmem [resolvable:$true] %s78_s23 }
  0x32   :  { %s1000_s8 = scalar_lea.vmem %s55_s21, 64  ;;  %p1005_p7 = scmp.lt.s32.totalorder %s55_s21, %s55_s21 }
  0x33   :  { %p1001_p6 = scmp.ne.s32.totalorder %s55_s21, %s1000_s8  ;;  %p1006_p8 = scmp.lt.s32.totalorder %s1000_s8, %s1000_s8 }
  0x35   :  { %p1007_p9 = por %p1006_p8, %p1005_p7 }
  0x37   :  { %p1008_p10 = pnand %p1007_p9, %p1001_p6 }
  0x39   :  { %1011 = shalt.err (!%p1008_p10)
}
  0x3a   :  { %57 = dma.hbm_to_vmem [thread:$0]  %s1282_s3, 64, %s55_s21, [#allocation6]  }
  0x3b   :  { %s1020_s26 = scalar_lea.vmem %s79_s23, 16  ;;  %s1024_s0 = scalar_lea.vmem %s79_s23, 32 }
  0x3c   :  { %p1021_p11 = scmp.ne.s32.totalorder %s79_s23, %s1020_s26  ;;  %p1025_p12 = scmp.lt.s32.totalorder %s79_s23, %s79_s23 }
  0x3d   :  { %p1026_p13 = scmp.lt.s32.totalorder %s1024_s0, %s1020_s26 }
  0x3f   :  { %p1027_p0 = por %p1026_p13, %p1025_p12 }
  0x41   :  { %p1028_p1 = pnand %p1027_p0, %p1021_p11 }
  0x43   :  { %1031 = shalt.err (!%p1028_p1)
}
  0x44   :  { %81 = dma.hbm_to_vmem [thread:$0]  %s1286_s7, 16, %s79_s23, [#allocation9]  }
  0x45   :  { %s1090_s29 = smov [#allocation13]  }
  0x46   :  { %s98_s2 = sshll.u32 %s1090_s29, 4  ;;  %s99_s2 = int_to_ptr.vmem [resolvable:$true] %s98_s2 }
  0x47   :  { %s1040_s30 = scalar_lea.vmem %s99_s2, 16  ;;  %s1044_s15 = scalar_lea.vmem %s99_s2, 32 }
  0x48   :  { %p1041_p2 = scmp.ne.s32.totalorder %s99_s2, %s1040_s30  ;;  %p1045_p3 = scmp.lt.s32.totalorder %s99_s2, %s99_s2 }
  0x49   :  { %p1046_p4 = scmp.lt.s32.totalorder %s1044_s15, %s1040_s30 }
  0x4b   :  { %p1047_p5 = por %p1046_p4, %p1045_p3 }
  0x4d   :  { %p1048_p6 = pnand %p1047_p5, %p1041_p2 }
  0x4f   :  { %1051 = shalt.err (!%p1048_p6)
}
  0x50   :  { %101 = dma.hbm_to_vmem [thread:$0]  %s1288_s9, 16, %s99_s2, [#allocation12]  }
  0x51   :  { %1072 = dma.done.wait [#allocation3], 128  }
  0x52   :  { %1073 = vsyncadd [#allocation3], 4294967168 }
  0x53   :  { %1074 = dma.done.wait [#allocation6], 80  }
  0x54   :  { %1075 = vsyncadd [#allocation6], 4294967216 }
  0x55   :  { %1076 = dma.done.wait [#allocation9], 32  }
  0x56   :  { %1077 = vsyncadd [#allocation9], 4294967264 }
  0x57   :  { %1078 = dma.done.wait [#allocation12], 32  }
  0x58   :  { %1079 = vsyncadd [#allocation12], 4294967264  ;;  %v1091_v0 = vmov 0.0   ;;  %vm1092_vm0 = vmmov 0   ;;  %v887_v1 = vld [vmem:[%s1280_s1 + $0x8] sm:$0xff]   ;;  %v888_v2 = vld [vmem:[%s1280_s1] sm:$0xff]  }
  0x59   :  { %819 = vmatprep.subr.bf16.mxu0 %v1091_v0  ;;  %823 = vmatprep.mubr.msk.bf16.mxu0 %vm1092_vm0, %v1091_v0  ;;  %vm162_vm1 = vcmask 261120   ;;  %v132_v3 = vld [vmem:[#allocation2] sm:$0xf]  ;;  %v133_v4 = vld [vmem:[#allocation2 + $0x4] sm:$0xf]  ;;  %vm271_vm2 = vcmask 60416  }
  0x5a   :  { %833 = vmatprep.subr.bf16.mxu1 %v1091_v0  ;;  %835 = vmatprep.mubr.msk.bf16.mxu1 %vm1092_vm0, %v1091_v0  ;;  %v772_v5 = vcombine.low %v132_v3, %v133_v4  ;;  %v771_v6 = vld [vmem:[#allocation5] ss:$0 sm:$0xff]  ;;  %vm300_vm3 = vcmask 1043456   ;;  %vm296_vm4 = vcmask 64512   ;;  %v891_v38 = vld [vmem:[%s1283_s4] sm:$0xff]   ;;  %vm460_vm5 = vcmask 257024  }
  0x5b   :  { %820 = vmatpush3.bf16.msra.mxu0 %v887_v1  ;;  %v302_v27 = vsel %vm300_vm3, %v132_v3, 0  ;;  %v348_v28 = vsel %vm300_vm3, %v133_v4, 0  ;;  %v890_v37 = vld [vmem:[%s1283_s4 + $0x8] sm:$0xff]   ;;  %v893_v50 = vld [vmem:[%s1285_s6] sm:$0xff]   ;;  %vm502_vm6 = vcmask 1041409   ;;  %vm560_vm7 = vcmask 254976  }
  0x5c   :  { %821 = vmatprep.subr.bf16.mxu0 %v1091_v0  ;;  %834 = vmatpush3.bf16.msra.mxu1 %v348_v28  ;;  %v892_v49 = vld [vmem:[%s1285_s6 + $0x8] sm:$0xff]   ;;  %vm707_vm8 = vcmask 523264   ;;  %s1093_s17 = smov [#allocation14]  }
  0x5d   :  { %847 = vmatprep.subr.bf16.mxu1 %v1091_v0  ;;  %v457_v51 = vld [vmem:[#allocation7] sm:$0xf]  ;;  %s759_s7 = sshll.u32 %s1093_s17, 4  ;;  %s760_s7 = int_to_ptr.vmem [resolvable:$true] %s759_s7 }
  0x5e   :  { %s1052_s9 = scalar_lea.vmem %s760_s7, 32  ;;  %p1057_p8 = scmp.lt.s32.totalorder %s760_s7, %s760_s7 }
  0x5f   :  { %822 = vmatpush3.bf16.msra.mxu0 %v888_v2  ;;  %p1053_p7 = scmp.ne.s32.totalorder %s760_s7, %s1052_s9  ;;  %p1058_p9 = scmp.lt.s32.totalorder %s1052_s9, %s1052_s9 }
  0x60   :  { %827 = vmatprep.subr.bf16.mxu0 %v1091_v0 }
  0x61   :  { %p1059_p10 = por %p1058_p9, %p1057_p8 }
  0x62   :  { %824 = vmatmul.mubr.msk.bf16.vlgmr.msra.gmra.mxu0 %vm162_vm1, %v772_v5 }
  0x63   :  { %829 = vmatprep.mubr.msk.bf16.mxu0 %vm1092_vm0, %v1091_v0  ;;  %828 = vmatpush3.bf16.msra.mxu0 %v302_v27  ;;  %p1060_p11 = pnand %p1059_p10, %p1053_p7 }
  0x64   :  { %839 = vmatprep.subr.bf16.mxu0 %v1091_v0 }
 0x122   :  { %v200_v7 = vpop.f32.mrf.mxu0 }
 0x123   :  { %v201_v8 = vadd.f32 %v771_v6, %v200_v7  ;;  %v781_v7 = vld [vmem:[#allocation8] ss:$0 sm:$0xff] }
 0x124   :  { %v825_v9 = vpop.f32.mrf.mxu0 }
 0x125   :  { %207 = vxpose.xlu0.b32.start.end [1/1] (short) (narrow) %v201_v8, 8 }
 0x126   :  { %v203_v10 = vpop.f32.mrf.mxu0 }
 0x127   :  { %v204_v11 = vadd.f32 %v771_v6, %v203_v10 }
 0x128   :  { %v826_v12 = vpop.f32.mrf.mxu0 }
 0x129   :  { %239 = vxpose.xlu0.b32.start.end [1/1] (short) (narrow) %v204_v11, 8 }
 0x1a1   :  { %v223_v13 = vpop.trf.xlu0 }
 0x1a2   :  { %v272_v14 = vsel %vm271_vm2, %v223_v13, -inf }
 0x1a3   :  { %273 = vmax.xlane.f32.xlu1 %v272_v14 }
 0x1a5   :  { %v255_v15 = vpop.trf.xlu0 }
 0x1a6   :  { %v275_v16 = vsel %vm271_vm2, %v255_v15, -inf }
 0x1a7   :  { %276 = vmax.xlane.f32.xlu1 %v275_v16 }
 0x22c   :  { %v274_v17 = vpop.xlane.xlu1 %273 }
 0x22d   :  { %v278_v18 = vsub.f32 %v223_v13, %v274_v17 }
 0x22f   :  { %v280_v19 = vmul.f32 1.442695, %v278_v18 }
 0x230   :  { %v277_v20 = vpop.xlane.xlu1 %276 }
 0x231   :  { %900 = vpow2.f32 %v280_v19  ;;  %v279_v21 = vsub.f32 %v255_v15, %v277_v20  ;;  %v782_v20 = vld [vmem:[#allocation10] ss:$0 sm:$0xff] }
 0x233   :  { %v282_v22 = vmul.f32 1.442695, %v279_v21 }
 0x235   :  { %902 = vpow2.f32 %v282_v22 }
 0x23e   :  { %v901_v23 = vpop.eup %900 }
 0x23f   :  { %v284_v24 = vsel %vm271_vm2, %v901_v23, 0.0 }
 0x240   :  { %285 = vadd.xlane.f32.xlu0 %v284_v24 }
 0x242   :  { %v903_v25 = vpop.eup %902 }
 0x243   :  { %v287_v26 = vsel %vm271_vm2, %v903_v25, 0.0 }
 0x244   :  { %288 = vadd.xlane.f32.xlu1 %v287_v26 }
 0x2c9   :  { %v286_v29 = vpop.xlane.xlu0 %285 }
 0x2ca   :  { %904 = vrcp.f32 %v286_v29 }
 0x2cd   :  { %v289_v30 = vpop.xlane.xlu1 %288 }
 0x2ce   :  { %906 = vrcp.f32 %v289_v30 }
 0x2d7   :  { %v905_v31 = vpop.eup %904 }
 0x2d8   :  { %v292_v32 = vmul.f32 %v905_v31, %v901_v23 }
 0x2da   :  { %v294_v33 = vpack.c.bf16 %v292_v32, %v292_v32  ;;  %v894_v32 = vld [vmem:[%s1289_s10 + $0x8] sm:$0xff]  }
 0x2db   :  { %v907_v34 = vpop.eup %906 }
 0x2dc   :  { %830 = vmatmul.mubr.msk.bf16.vlgmr.msra.gmra.mxu0 %vm296_vm4, %v294_v33  ;;  %v293_v35 = vmul.f32 %v907_v34, %v903_v25  ;;  %v895_v33 = vld [vmem:[%s1289_s10] sm:$0xff]  }
 0x2dd   :  { %843 = vmatprep.mubr.msk.bf16.mxu0 %vm1092_vm0, %v1091_v0  ;;  %840 = vmatpush3.bf16.msra.mxu0 %v890_v37 }
 0x2de   :  { %v295_v36 = vpack.c.bf16 %v293_v35, %v293_v35  ;;  %841 = vmatprep.subr.bf16.mxu0 %v1091_v0 }
 0x2e0   :  { %836 = vmatmul.mubr.msk.bf16.vlgmr.msra.gmra.mxu1 %vm296_vm4, %v295_v36 }
 0x2e1   :  { %851 = vmatprep.mubr.msk.bf16.mxu1 %vm1092_vm0, %v1091_v0  ;;  %842 = vmatpush3.bf16.msra.mxu0 %v891_v38  ;;  %v786_v38 = vld [vmem:[#allocation11] ss:$0 sm:$0xff] }
 0x2e2   :  { %855 = vmatprep.subr.bf16.mxu0 %v1091_v0  ;;  %848 = vmatpush3.bf16.msra.mxu1 %v892_v49 }
 0x2e3   :  { %849 = vmatprep.subr.bf16.mxu1 %v1091_v0 }
 0x2e6   :  { %850 = vmatpush3.bf16.msra.mxu1 %v893_v50 }
 0x2e7   :  { %863 = vmatprep.subr.bf16.mxu1 %v1091_v0 }
 0x39c   :  { %v338_v39 = vpop.f32.mrf.mxu0 }
 0x39e   :  { %v831_v40 = vpop.f32.mrf.mxu0 }
 0x39f   :  { %v787_v40 = vld [vmem:[#allocation13] ss:$0 sm:$0xff] }
 0x3a0   :  { %v341_v41 = vpop.f32.mrf.mxu0  ;;  %v384_v42 = vpop.f32.mrf.mxu1 }
 0x3a1   :  { %v392_v43 = vcombine.low %v338_v39, %v384_v42 }
 0x3a2   :  { %v832_v44 = vpop.f32.mrf.mxu0  ;;  %v837_v45 = vpop.f32.mrf.mxu1 }
 0x3a3   :  { %v394_v46 = vpack.c.bf16 %v392_v43, %v392_v43  ;;  %v896_v44 = vld [vmem:[%s1291_s12 + $0x18] sm:$0xff]   ;;  %v897_v45 = vld [vmem:[%s1291_s12 + $0x10] sm:$0xff]  }
 0x3a4   :  { %v387_v47 = vpop.f32.mrf.mxu1 }
 0x3a5   :  { %844 = vmatmul.mubr.msk.bf16.vlgmr.msra.gmra.mxu0 %vm162_vm1, %v394_v46  ;;  %v898_v46 = vld [vmem:[%s1291_s12 + $0x8] sm:$0xff]   ;;  %v899_v47 = vld [vmem:[%s1291_s12] sm:$0xff]  }
 0x3a6   :  { %v838_v48 = vpop.f32.mrf.mxu1  ;;  %859 = vmatprep.mubr.msk.bf16.mxu0 %vm1092_vm0, %v1091_v0  ;;  %856 = vmatpush3.bf16.msra.mxu0 %v894_v32 }
 0x3a7   :  { %857 = vmatprep.subr.bf16.mxu0 %v1091_v0  ;;  %v788_v48 = vld [vmem:[%s1290_s11] ss:$0 sm:$0xff] }
 0x3aa   :  { %858 = vmatpush3.bf16.msra.mxu0 %v895_v33 }
 0x465   :  { %v448_v52 = vpop.f32.mrf.mxu0 }
 0x466   :  { %v455_v53 = vcombine.high %v448_v52, %v448_v52  ;;  %v458_v54 = vmul.f32 %v457_v51, %v448_v52 }
 0x467   :  { %v845_v55 = vpop.f32.mrf.mxu0 }
 0x468   :  { %v459_v56 = vmul.f32 %v457_v51, %v455_v53  ;;  %v461_v57 = vsel %vm460_vm5, %v458_v54, 0.0 }
 0x469   :  { %v462_v58 = vrot.slane %v461_v57, 4  ;;  %v451_v59 = vpop.f32.mrf.mxu0 }
 0x46a   :  { %v468_v60 = vsel %vm460_vm5, %v459_v56, 0.0 }
 0x46b   :  { %v463_v61 = vadd.f32 %v462_v58, %v461_v57  ;;  %v469_v62 = vrot.slane %v468_v60, 4  ;;  %v846_v63 = vpop.f32.mrf.mxu0 }
 0x46c   :  { %v792_v63 = vld [vmem:[%s1292_s13] ss:$0 sm:$0xff] }
 0x46d   :  { %v464_v1 = vrot.slane %v463_v61, 2  ;;  %v470_v2 = vadd.f32 %v469_v62, %v468_v60 }
 0x46f   :  { %v465_v3 = vadd.f32 %v464_v1, %v463_v61  ;;  %v471_v4 = vrot.slane %v470_v2, 2 }
 0x471   :  { %v466_v5 = vrot.slane %v465_v3, 1  ;;  %v472_v6 = vadd.f32 %v471_v4, %v470_v2 }
 0x473   :  { %v467_v8 = vadd.f32 %v466_v5, %v465_v3  ;;  %v473_v9 = vrot.slane %v472_v6, 1 }
 0x475   :  { %v474_v10 = vadd.f32 %v473_v9, %v472_v6  ;;  %v482_v11 = vadd.f32 %v781_v7, %v467_v8 }
 0x477   :  { %v483_v12 = vadd.f32 %v781_v7, %v474_v10  ;;  %v484_v13 = vpack.c.bf16 %v482_v11, %v482_v11 }
 0x479   :  { %v485_v14 = vpack.c.bf16 %v483_v12, %v483_v12  ;;  %v499_v16 = vunpack.c.l.b16 %v484_v13 }
 0x47b   :  { %v500_v15 = vunpack.c.l.b16 %v485_v14 }
 0x47d   :  { %v501_v17 = vrot.slane %v500_v15, 7 }
 0x47f   :  { %v503_v18 = vsel %vm502_vm6, %v501_v17, %v499_v16 }
 0x480   :  { %v504_v19 = vpack.c.b16 %v503_v18, %v503_v18 }
 0x482   :  { %852 = vmatmul.mubr.msk.bf16.vlgmr.msra.gmra.mxu1 %vm162_vm1, %v504_v19 }
 0x483   :  { %871 = vmatprep.mubr.msk.bf16.mxu1 %vm1092_vm0, %v1091_v0  ;;  %864 = vmatpush3.bf16.msra.mxu1 %v896_v44 }
 0x484   :  { %865 = vmatprep.subr.bf16.mxu1 %v1091_v0 }
 0x487   :  { %866 = vmatpush3.bf16.msra.mxu1 %v897_v45 }
 0x488   :  { %867 = vmatprep.subr.bf16.mxu1 %v1091_v0 }
 0x48b   :  { %868 = vmatpush3.bf16.msra.mxu1 %v898_v46 }
 0x48c   :  { %869 = vmatprep.subr.bf16.mxu1 %v1091_v0 }
 0x48f   :  { %870 = vmatpush3.bf16.msra.mxu1 %v899_v47 }
 0x542   :  { %v554_v21 = vpop.f32.mrf.mxu1 }
 0x543   :  { %v1239_v22 = vadd.f32 %v782_v20, %v554_v21 }
 0x544   :  { %v853_v23 = vpop.f32.mrf.mxu1 }
 0x545   :  { %v561_v24 = vsel %vm560_vm7, %v1239_v22, 0.0 }
 0x546   :  { %562 = vadd.xlane.f32.xlu1 %v561_v24  ;;  %v557_v25 = vpop.f32.mrf.mxu1 }
 0x548   :  { %v854_v26 = vpop.f32.mrf.mxu1 }
 0x5cf   :  { %v563_v27 = vpop.xlane.xlu1 %562 }
 0x5d0   :  { %v565_v28 = vmul.f32 0.03125, %v563_v27 }
 0x5d2   :  { %v566_v29 = vsub.f32 %v1239_v22, %v565_v28 }
 0x5d4   :  { %v567_v30 = vmul.f32 %v566_v29, %v566_v29 }
 0x5d6   :  { %v568_v31 = vsel %vm560_vm7, %v567_v30, 0.0 }
 0x5d7   :  { %569 = vadd.xlane.f32.xlu1 %v568_v31 }
 0x660   :  { %v570_v34 = vpop.xlane.xlu1 %569 }
 0x661   :  { %v571_v35 = vmul.f32 0.03125, %v570_v34 }
 0x663   :  { %v572_v36 = vadd.f32 1e-06, %v571_v35 }
 0x665   :  { %908 = vrsqrt.f32 %v572_v36 }
 0x672   :  { %v909_v37 = vpop.eup %908 }
 0x673   :  { %v574_v39 = vmul.f32 %v909_v37, %v566_v29 }
 0x675   :  { %v582_v41 = vmul.f32 %v786_v38, %v574_v39 }
 0x677   :  { %v590_v42 = vadd.f32 %v787_v40, %v582_v41 }
 0x679   :  { %v591_v43 = vpack.c.bf16 %v590_v42, %v590_v42 }
 0x67b   :  { %860 = vmatmul.mubr.msk.bf16.vlgmr.msra.gmra.mxu0 %vm162_vm1, %v591_v43 }
 0x73b   :  { %v652_v49 = vpop.f32.mrf.mxu0 }
 0x73c   :  { %v653_v50 = vadd.f32 %v788_v48, %v652_v49 }
 0x73d   :  { %v861_v51 = vpop.f32.mrf.mxu0 }
 0x73e   :  { %v658_v52 = vmul.f32 %v653_v50, %v653_v50 }
 0x73f   :  { %v655_v53 = vpop.f32.mrf.mxu0 }
 0x740   :  { %v659_v54 = vmul.f32 %v658_v52, %v653_v50 }
 0x741   :  { %v862_v55 = vpop.f32.mrf.mxu0 }
 0x742   :  { %v660_v56 = vmul.f32 0.044715, %v659_v54 }
 0x744   :  { %v661_v57 = vadd.f32 %v660_v56, %v653_v50 }
 0x746   :  { %v662_v58 = vmul.f32 0.7978846, %v661_v57 }
 0x748   :  { %910 = vtanh.f32 %v662_v58 }
 0x755   :  { %v911_v0 = vpop.eup %910 }
 0x756   :  { %v664_v59 = vadd.f32 1.0, %v911_v0 }
 0x758   :  { %v665_v60 = vmul.f32 0.5, %v664_v59 }
 0x75a   :  { %v666_v61 = vmul.f32 %v665_v60, %v653_v50 }
 0x75c   :  { %v667_v62 = vpack.c.bf16 %v666_v61, %v666_v61 }
 0x75e   :  { %872 = vmatmul.mubr.msk.bf16.vlgmr.msra.gmra.mxu1 %vm707_vm8, %v667_v62 }
 0x81e   :  { %v745_v1 = vpop.f32.mrf.mxu1 }
 0x81f   :  { %v746_v2 = vadd.f32 %v792_v63, %v745_v1 }
 0x820   :  { %v873_v3 = vpop.f32.mrf.mxu1 }
 0x821   :  { %v751_v4 = vadd.f32 %v746_v2, %v1239_v22 }
 0x822   :  { %v748_v5 = vpop.f32.mrf.mxu1 }
 0x823   :  { %752 = vst.msk [vmem:[#allocation14] sm:$0x3] %vm560_vm7, %v751_v4 }
 0x824   :  { %v874_v6 = vpop.f32.mrf.mxu1 }
 0x825   :  { %1063 = shalt.err (!%p1060_p11)
}
 0x826   :  { %762 = dma.vmem_to_hbm [thread:$0]  %s760_s7, 32, %s1293_s14, [#allocation4]  }
 0x827   :  { %1080 = dma.done.wait [#allocation4], 32  }
 0x828   :  { %1081 = vsyncadd [#allocation4], 4294967264 }
 0x829   :  { %766 = vsyncpa [#allocation3], 1 }
 0x82a   :  { %767 = vsyncpa [#allocation6], 1 }
 0x82b   :  { %768 = vsyncpa [#allocation9], 1 }
 0x82c   :  { %769 = vsyncpa [#allocation12], 1 }
 0x82d   :  { %770 = vsyncpa [#allocation4], 1 }

</bundles_post_ra>
